<compile_context>
chip_gen: v7x
topology: tpu7x:2x2x1
jax: 0.10.0
libtpu: 0.0.40
codegen_flags: <defaults>
</compile_context>

<pallas_src>
import math
from typing import NamedTuple

import jax
import jax.numpy as jnp
from jax.experimental import pallas as pl
from jax.experimental.pallas import tpu as pltpu

_INV_SQRT2 = 1.0 / math.sqrt(2.0)


def _round_up(x, m):
    return (x + m - 1) // m * m


def _device_kind():
    try:
        return jax.devices()[0].device_kind.lower()
    except Exception:
        return ""


def _vmem_capacity_bytes():
    try:
        return int(pltpu.get_tpu_info().vmem_capacity_bytes)
    except Exception:
        return 64 << 20  # conservative default = v7x physical VMEM


def _resident_spec(shape, index_map):
    """BlockSpec for an operand that is identical at every grid step.

    Buffered(1) drops the default double-buffering (the block is DMA'd once),
    halving resident-weight VMEM.
    """
    if hasattr(pl, "Buffered"):
        return pl.BlockSpec(shape, index_map, pipeline_mode=pl.Buffered(1))
    return pl.BlockSpec(shape, index_map)


# ----------------------------- kernels --------------------------------------
def _mlp_kernel(x_ref, w1_ref, b1_ref, w2_ref, b2_ref, o_ref):
    # x tile: (TM, H); weights arrive pre-cast to bf16, biases stay f32.
    x = x_ref[...].astype(jnp.bfloat16)
    # Linear 1: hidden -> hidden//2  (bf16 operands, f32 accumulate on MXU)
    h = jnp.dot(x, w1_ref[...], preferred_element_type=jnp.float32) + b1_ref[...]
    # Exact (erf) GELU in f32 — matches torch.nn.GELU() default.
    h = 0.5 * h * (1.0 + jax.lax.erf(h * _INV_SQRT2))
    # Linear 2: hidden//2 -> labels_pad (lane-dense, 128-multiple output)
    o = jnp.dot(h.astype(jnp.bfloat16), w2_ref[...],
                preferred_element_type=jnp.float32) + b2_ref[...]
    o_ref[...] = o.astype(o_ref.dtype)


def _mlp_kernel_ksplit(x_ref, w1_ref, b1_ref, w2_ref, b2_ref, o_ref, acc_ref):
    # Grid = (row tiles [parallel], K chunks over hidden [arbitrary]).
    k = pl.program_id(1)

    @pl.when(k == 0)
    def _():
        acc_ref[...] = jnp.zeros_like(acc_ref)

    acc_ref[...] += jnp.dot(x_ref[...].astype(jnp.bfloat16), w1_ref[...],
                            preferred_element_type=jnp.float32)

    @pl.when(k == pl.num_programs(1) - 1)
    def _():
        h = acc_ref[...] + b1_ref[...]
        h = 0.5 * h * (1.0 + jax.lax.erf(h * _INV_SQRT2))
        o = jnp.dot(h.astype(jnp.bfloat16), w2_ref[...],
                    preferred_element_type=jnp.float32) + b2_ref[...]
        o_ref[...] = o.astype(o_ref.dtype)


# ----------------------------- parameters -----------------------------------
class ClassifierParams(NamedTuple):
    w1: jax.Array       # [hidden, mid]        bf16
    b1: jax.Array       # [1, mid]             f32
    w2: jax.Array       # [mid, labels_pad]    bf16 (zero-padded columns)
    b2: jax.Array       # [1, labels_pad]      f32  (zero-padded)
    labels_num: int     # static: true number of labels


def prepare_classifier_params(w1, b1, w2, b2) -> ClassifierParams:
    """One-time weight prep (hoisted out of the per-call path).

    Casts matmul operands to bf16 and zero-pads the output projection columns
    to a multiple of 128 so the kernel's store is lane-dense / unmasked.
    Call once per parameter set and reuse across forward calls.
    """
    hidden, mid = w1.shape
    mid2, labels_num = w2.shape
    assert mid == mid2
    labels_pad = _round_up(labels_num, 128)
    w1b = w1.astype(jnp.bfloat16)
    b1f = jnp.asarray(b1, jnp.float32).reshape(1, mid)
    w2p = jnp.zeros((mid, labels_pad), jnp.bfloat16)
    w2p = w2p.at[:, :labels_num].set(w2.astype(jnp.bfloat16))
    b2p = jnp.zeros((1, labels_pad), jnp.float32)
    b2p = b2p.at[:, :labels_num].set(jnp.asarray(b2, jnp.float32).reshape(1, labels_num))
    return ClassifierParams(w1b, b1f, w2p, b2p, labels_num)


# ----------------------------- forward --------------------------------------
def classifier_forward(queries, params: ClassifierParams, *, row_tile=512, k_tile=None):
    """queries: [..., features_num, hidden] -> [..., features_num, labels_num]

    `queries` may be f32 or bf16 (bf16 is consumed directly; no extra cast pass).
    """
    *lead, hidden = queries.shape
    hidden_w, mid = params.w1.shape
    assert hidden == hidden_w, (hidden, hidden_w)
    labels_pad = params.w2.shape[1]
    labels_num = params.labels_num

    x2d = queries.reshape(-1, hidden)
    rows = x2d.shape[0]
    x_bytes = x2d.dtype.itemsize
    out_dtype = queries.dtype
    out_bytes = jnp.dtype(out_dtype).itemsize

    capacity = _vmem_capacity_bytes()
    budget = max(32 << 20, int(capacity * 0.75))   # generation-aware VMEM clamp

    # ---- decide whether to stream w1 over a K (hidden) grid axis -----------
    w1_bytes = hidden * mid * 2                    # bf16, single-buffered
    if k_tile is None:
        # Stream w1 when full-block residency would eat too much VMEM
        # (v7x: 64 MiB physical; v6e: keeps scoped budget sane for big hidden).
        k_tile = 512 if (w1_bytes > min(24 << 20, budget // 3) and hidden % 128 == 0) else 0
    if k_tile:
        # k_tile must be a 128-multiple that divides hidden (avoid garbage in a
        # masked partial-K block feeding the MXU accumulator).
        k_tile = min(_round_up(k_tile, 128), hidden)
        while k_tile > 0 and hidden % k_tile != 0:
            k_tile -= 128
        if k_tile >= hidden or k_tile <= 0:
            k_tile = 0
    ksplit = k_tile > 0
    hb = k_tile if ksplit else hidden              # x block width on the lane axis

    # ---- resident (non row-tiled) VMEM --------------------------------------
    if ksplit:
        w1_resident = 2 * k_tile * mid * 2         # streamed, double-buffered
    else:
        w1_resident = hidden * mid * 2             # Buffered(1)
    resident = (w1_resident
                + mid * labels_pad * 2             # w2 (Buffered(1))
                + mid * 4 + labels_pad * 4)        # biases (f32)

    # ---- row tile: as large as the budget allows (amortizes ~0.35us/step) ---
    per_row = 2 * (hb * x_bytes + labels_pad * out_bytes)   # x/out double-buffered
    if ksplit:
        per_row += mid * 4                         # f32 accumulator scratch
    avail = budget - resident - (6 << 20)          # headroom for compiler temps
    tile_cap = max(8, (avail // max(per_row, 1)) // 8 * 8)
    tile_rows = int(min(row_tile, tile_cap, _round_up(rows, 8)))
    tile_rows = max(8, tile_rows // 8 * 8)

    # v7x has 2 TensorCores: make sure the "parallel" row axis has >= 2 tiles.
    if "v7" in _device_kind() and tile_rows >= rows and rows >= 16:
        tile_rows = _round_up((rows + 1) // 2, 8)

    n_row_tiles = pl.cdiv(rows, tile_rows)

    vmem_est = (2 * tile_rows * hb * x_bytes
                + 2 * tile_rows * labels_pad * out_bytes
                + (tile_rows * mid * 4 if ksplit else 0)
                + resident)
    vmem_limit = int(min(max(vmem_est + (8 << 20), 32 << 20), budget))

    if ksplit:
        grid = (n_row_tiles, hidden // k_tile)
        in_specs = [
            pl.BlockSpec((tile_rows, k_tile), lambda i, k: (i, k)),    # x tile
            pl.BlockSpec((k_tile, mid), lambda i, k: (k, 0)),          # w1 chunk
            _resident_spec((1, mid), lambda i, k: (0, 0)),             # b1
            _resident_spec((mid, labels_pad), lambda i, k: (0, 0)),    # w2
            _resident_spec((1, labels_pad), lambda i, k: (0, 0)),      # b2
        ]
        out_spec = pl.BlockSpec((tile_rows, labels_pad), lambda i, k: (i, 0))
        scratch = [pltpu.VMEM((tile_rows, mid), jnp.float32)]
        kernel = _mlp_kernel_ksplit
        dims = ("parallel", "arbitrary")
    else:
        grid = (n_row_tiles,)
        in_specs = [
            pl.BlockSpec((tile_rows, hidden), lambda i: (i, 0)),       # x tile
            _resident_spec((hidden, mid), lambda i: (0, 0)),           # w1 (full)
            _resident_spec((1, mid), lambda i: (0, 0)),                # b1
            _resident_spec((mid, labels_pad), lambda i: (0, 0)),       # w2 (padded)
            _resident_spec((1, labels_pad), lambda i: (0, 0)),         # b2 (padded)
        ]
        out_spec = pl.BlockSpec((tile_rows, labels_pad), lambda i: (i, 0))
        scratch = []
        kernel = _mlp_kernel
        dims = ("parallel",)

    out = pl.pallas_call(
        kernel,
        out_shape=jax.ShapeDtypeStruct((rows, labels_pad), out_dtype),
        grid_spec=pltpu.PrefetchScalarGridSpec(
            num_scalar_prefetch=0,
            grid=grid,
            in_specs=in_specs,
            out_specs=out_spec,
            scratch_shapes=scratch,
        ),
        compiler_params=pltpu.CompilerParams(
            dimension_semantics=dims,
            vmem_limit_bytes=vmem_limit),
    )(x2d, params.w1, params.b1, params.w2, params.b2)

    # TODO(synk): let downstream consume the padded (rows, labels_pad) slab
    # (and/or a bf16 result) to skip this extra HBM pass over the output.
    out = out[:, :labels_num]
    return out.reshape(*lead, labels_num)


# ----------------------------- init & references -----------------------------
def init_classifier_params(key, hidden_size, types_num, additional_none=True,
                           dtype=jnp.float32):
    labels_num = types_num + (1 if additional_none else 0)
    mid = hidden_size // 2
    k1, k2, k3, k4 = jax.random.split(key, 4)
    bound1 = 1.0 / math.sqrt(hidden_size)
    bound2 = 1.0 / math.sqrt(mid)
    w1 = jax.random.uniform(k1, (hidden_size, mid), dtype, -bound1, bound1)
    b1 = jax.random.uniform(k2, (1, mid), dtype, -bound1, bound1)
    w2 = jax.random.uniform(k3, (mid, labels_num), dtype, -bound2, bound2)
    b2 = jax.random.uniform(k4, (1, labels_num), dtype, -bound2, bound2)
    return w1, b1, w2, b2


def classifier_ref(queries, w1, b1, w2, b2):
    # All-f32 reference (matches the PyTorch module exactly).
    h = queries @ w1 + b1[0]
    h = 0.5 * h * (1.0 + jax.lax.erf(h / jnp.sqrt(2.0)))
    return h @ w2 + b2[0]


def classifier_ref_bf16(queries, w1, b1, w2, b2):
    # Mirrors the kernel's precision: bf16 matmul operands, f32 accumulate,
    # f32 bias + GELU.
    h = jnp.dot(queries.astype(jnp.bfloat16), w1.astype(jnp.bfloat16),
                preferred_element_type=jnp.float32) + b1[0]
    h = 0.5 * h * (1.0 + jax.lax.erf(h / jnp.sqrt(2.0)))
    return jnp.dot(h.astype(jnp.bfloat16), w2.astype(jnp.bfloat16),
                   preferred_element_type=jnp.float32) + b2[0]


if __name__ == "__main__":
    key = jax.random.PRNGKey(0)
    batch, features_num = 2, 8

    # --- Test 1: resident-w1 path (small module-like shapes) -----------------
    hidden_size, types_num = 32, 4            # labels_num = 5 (additional_none)
    kp, kx = jax.random.split(key)
    w1, b1, w2, b2 = init_classifier_params(kp, hidden_size, types_num, True)
    params = prepare_classifier_params(w1, b1, w2, b2)   # one-time weight prep
    queries = jax.random.normal(kx, (batch, features_num, hidden_size),
                                dtype=jnp.float32)

    out = jax.block_until_ready(classifier_forward(queries, params))
    assert out.shape == (batch, features_num, types_num + 1), out.shape

    ref_bf16 = classifier_ref_bf16(queries, w1, b1, w2, b2)
    assert jnp.allclose(out, ref_bf16, atol=2e-3, rtol=2e-3), \
        float(jnp.max(jnp.abs(out - ref_bf16)))
    ref_f32 = classifier_ref(queries, w1, b1, w2, b2)
    assert jnp.allclose(out, ref_f32, atol=2e-2, rtol=2e-2), \
        float(jnp.max(jnp.abs(out - ref_f32)))

    # --- Test 2: streamed-w1 (K-split) path, forced at a small shape ----------
    hidden2, types2 = 256, 10
    kp2, kx2 = jax.random.split(kp)
    w1c, b1c, w2c, b2c = init_classifier_params(kp2, hidden2, types2, True)
    params2 = prepare_classifier_params(w1c, b1c, w2c, b2c)
    queries2 = jax.random.normal(kx2, (batch, features_num, hidden2),
                                 dtype=jnp.float32)
    out2 = jax.block_until_ready(classifier_forward(queries2, params2, k_tile=128))
    assert out2.shape == (batch, features_num, types2 + 1), out2.shape
    ref2 = classifier_ref_bf16(queries2, w1c, b1c, w2c, b2c)
    assert jnp.allclose(out2, ref2, atol=5e-3, rtol=5e-3), \
        float(jnp.max(jnp.abs(out2 - ref2)))

    print("KERNEL_OK")
</pallas_src>

<mosaic_0001>
module attributes {stable_mosaic.version = 11 : i64} {
  func.func @_mlp_kernel(%arg0: i32, %arg1: memref<16x32xf32, #tpu.memory_space<vmem>>, %arg2: memref<32x16xbf16, #tpu.memory_space<vmem>>, %arg3: memref<1x16xf32, #tpu.memory_space<vmem>>, %arg4: memref<16x128xbf16, #tpu.memory_space<vmem>>, %arg5: memref<1x128xf32, #tpu.memory_space<vmem>>, %arg6: memref<16x128xf32, #tpu.memory_space<vmem>>) attributes {dimension_semantics = [#tpu.dimension_semantics<parallel>], iteration_bounds = array<i64: 1>, scalar_prefetch = 0 : i64, scratch_operands = 0 : i64, tpu.core_type = #tpu.core_type<tc>, window_params = [{transform_indices = @transform_0, window_bounds = array<i64: 16, 32>}, {pipeline_mode = #tpu.pipeline_mode<synchronous>, transform_indices = @transform_1, window_bounds = array<i64: 32, 16>}, {pipeline_mode = #tpu.pipeline_mode<synchronous>, transform_indices = @transform_2, window_bounds = array<i64: 1, 16>}, {pipeline_mode = #tpu.pipeline_mode<synchronous>, transform_indices = @transform_3, window_bounds = array<i64: 16, 128>}, {pipeline_mode = #tpu.pipeline_mode<synchronous>, transform_indices = @transform_4, window_bounds = array<i64: 1, 128>}, {transform_indices = @transform_5, window_bounds = array<i64: 16, 128>}]} {
    %c0 = arith.constant 0 : index
    %c0_0 = arith.constant 0 : index
    %0 = vector.load %arg1[%c0, %c0_0] : memref<16x32xf32, #tpu.memory_space<vmem>>, vector<16x32xf32>
    %1 = arith.truncf %0 : vector<16x32xf32> to vector<16x32xbf16>
    %c0_1 = arith.constant 0 : index
    %c0_2 = arith.constant 0 : index
    %2 = vector.load %arg2[%c0_1, %c0_2] : memref<32x16xbf16, #tpu.memory_space<vmem>>, vector<32x16xbf16>
    %cst = arith.constant dense<0.000000e+00> : vector<16x16xf32>
    %3 = tpu.matmul %1, %2, %cst {dimension_numbers = #tpu.dot_dimension_numbers<[1], [0], [0], [1], [0, 0, 1, 1], [], []>} : vector<16x32xbf16>, vector<32x16xbf16>, vector<16x16xf32> -> vector<16x16xf32>
    %c0_3 = arith.constant 0 : index
    %c0_4 = arith.constant 0 : index
    %4 = vector.load %arg3[%c0_3, %c0_4] : memref<1x16xf32, #tpu.memory_space<vmem>>, vector<1x16xf32>
    %5 = vector.broadcast %4 : vector<1x16xf32> to vector<16x16xf32>
    %6 = arith.addf %3, %5 : vector<16x16xf32>
    %cst_5 = arith.constant 5.000000e-01 : f32
    %7 = vector.broadcast %cst_5 : f32 to vector<16x16xf32>
    %8 = arith.mulf %7, %6 : vector<16x16xf32>
    %cst_6 = arith.constant 0.707106769 : f32
    %9 = vector.broadcast %cst_6 : f32 to vector<16x16xf32>
    %10 = arith.mulf %6, %9 : vector<16x16xf32>
    %11 = math.erf %10 : vector<16x16xf32>
    %cst_7 = arith.constant 1.000000e+00 : f32
    %12 = vector.broadcast %cst_7 : f32 to vector<16x16xf32>
    %13 = arith.addf %12, %11 : vector<16x16xf32>
    %14 = arith.mulf %8, %13 : vector<16x16xf32>
    %15 = arith.truncf %14 : vector<16x16xf32> to vector<16x16xbf16>
    %c0_8 = arith.constant 0 : index
    %c0_9 = arith.constant 0 : index
    %16 = vector.load %arg4[%c0_8, %c0_9] : memref<16x128xbf16, #tpu.memory_space<vmem>>, vector<16x128xbf16>
    %cst_10 = arith.constant dense<0.000000e+00> : vector<16x128xf32>
    %17 = tpu.matmul %15, %16, %cst_10 {dimension_numbers = #tpu.dot_dimension_numbers<[1], [0], [0], [1], [0, 0, 1, 1], [], []>} : vector<16x16xbf16>, vector<16x128xbf16>, vector<16x128xf32> -> vector<16x128xf32>
    %c0_11 = arith.constant 0 : index
    %c0_12 = arith.constant 0 : index
    %18 = vector.load %arg5[%c0_11, %c0_12] : memref<1x128xf32, #tpu.memory_space<vmem>>, vector<1x128xf32>
    %19 = vector.broadcast %18 : vector<1x128xf32> to vector<16x128xf32>
    %20 = arith.addf %17, %19 : vector<16x128xf32>
    %c0_13 = arith.constant 0 : index
    %c0_14 = arith.constant 0 : index
    %21 = vector.load %arg6[%c0_13, %c0_14] : memref<16x128xf32, #tpu.memory_space<vmem>>, vector<16x128xf32>
    tpu.vector_store %arg6[%c0_13, %c0_14], %20 {strides = array<i32>} : memref<16x128xf32, #tpu.memory_space<vmem>>, vector<16x128xf32>,
    return
  }
  func.func @transform_0(%arg0: i32) -> (i32, i32) {
    %c0_i32 = arith.constant 0 : i32
    %c0_i32_0 = arith.constant 0 : i32
    return %arg0, %c0_i32 : i32, i32
  }
  func.func @transform_1(%arg0: i32) -> (i32, i32) {
    %c0_i32 = arith.constant 0 : i32
    %c0_i32_0 = arith.constant 0 : i32
    %c0_i32_1 = arith.constant 0 : i32
    return %c0_i32, %c0_i32_0 : i32, i32
  }
  func.func @transform_2(%arg0: i32) -> (i32, i32) {
    %c0_i32 = arith.constant 0 : i32
    %c0_i32_0 = arith.constant 0 : i32
    %c0_i32_1 = arith.constant 0 : i32
    return %c0_i32, %c0_i32_0 : i32, i32
  }
  func.func @transform_3(%arg0: i32) -> (i32, i32) {
    %c0_i32 = arith.constant 0 : i32
    %c0_i32_0 = arith.constant 0 : i32
    %c0_i32_1 = arith.constant 0 : i32
    return %c0_i32, %c0_i32_0 : i32, i32
  }
  func.func @transform_4(%arg0: i32) -> (i32, i32) {
    %c0_i32 = arith.constant 0 : i32
    %c0_i32_0 = arith.constant 0 : i32
    %c0_i32_1 = arith.constant 0 : i32
    return %c0_i32, %c0_i32_0 : i32, i32
  }
  func.func @transform_5(%arg0: i32) -> (i32, i32) {
    %c0_i32 = arith.constant 0 : i32
    %c0_i32_0 = arith.constant 0 : i32
    return %arg0, %c0_i32 : i32, i32
  }
}

</mosaic_0001>

<bundles_post_ra>
// kernel: tpu_custom_call.1
= control target key start
LH: loop header
LB: loop body
LE: loop exit
PB: predicated region body
PF: predicated region fallthrough
CT: control target
= control target key end

     0   :  { %v244_v1 = vmov 0.0   ;;  %vm245_vm0 = vmmov 0   ;;  %s312_s0 = inlined_call_operand.vmem [shape: f32[16,32], index: 0, kind: input, shape index: {}]   ;;  %s313_s1 = inlined_call_operand.vmem [shape: bf16[32,16], index: 1, kind: input, shape index: {}]   ;;  %s314_s2 = inlined_call_operand.vmem [shape: f32[1,16], index: 2, kind: input, shape index: {}]   ;;  %s315_s3 = inlined_call_operand.vmem [shape: bf16[16,128], index: 3, kind: input, shape index: {}]   ;;  %s316_s4 = inlined_call_operand.vmem [shape: f32[1,128], index: 4, kind: input, shape index: {}]   ;;  %s317_s5 = inlined_call_operand.hbm [shape: f32[16,128], index: 5, kind: output, shape index: {}]  }
   0x1   :  { %v213_v0 = vld [vmem:[%s313_s1] sm:$0xff]   ;;  %194 = vmatprep.subr.bf16.mxu0 %v244_v1  ;;  %202 = vmatprep.subr.bf16.mxu1 %v244_v1  ;;  %v214_v2 = vld [vmem:[%s313_s1 + $0x8] sm:$0xff]  }
   0x2   :  { %195 = vmatpush3.bf16.msra.mxu0 %v213_v0  ;;  %198 = vmatprep.mubr.msk.bf16.mxu0 %vm245_vm0, %v244_v1  ;;  %v22_v3 = vld [vmem:[%s312_s0] sm:$0xff]  ;;  %v23_v4 = vld [vmem:[%s312_s0 + $0x8] sm:$0xff] }
   0x3   :  { %196 = vmatprep.subr.bf16.mxu0 %v244_v1  ;;  %204 = vmatprep.mubr.msk.bf16.mxu1 %vm245_vm0, %v244_v1 }
   0x4   :  { %10 = vsyncpa [#allocation3], 0  ;;  %v24_v5 = vpack.c.bf16 %v23_v4, %v22_v3  ;;  %vm48_vm1 = vcmask 261120   ;;  %v215_v6 = vld [vmem:[%s315_s3] sm:$0xff]   ;;  %vm119_vm2 = vcmask 130048   ;;  %s246_s3 = smov [#allocation2]  }
   0x5   :  { %203 = vmatpush3.bf16.msra.mxu1 %v215_v6  ;;  %v182_v7 = vld [vmem:[%s314_s2] ss:$0 sm:$0xff]  ;;  %s171_s29 = sshll.u32 %s246_s3, 4  ;;  %s172_s29 = int_to_ptr.vmem [resolvable:$true] %s171_s29 }
   0x6   :  { %197 = vmatpush3.bf16.msra.mxu0 %v214_v2  ;;  %v186_v25 = vld [vmem:[%s316_s4] ss:$0 sm:$0xff]  ;;  %s220_s30 = scalar_lea.vmem %s172_s29, 256  ;;  %p225_p1 = scmp.lt.s32.totalorder %s172_s29, %s172_s29 }
   0x7   :  { %p221_p0 = scmp.ne.s32.totalorder %s172_s29, %s220_s30  ;;  %p226_p2 = scmp.lt.s32.totalorder %s220_s30, %s220_s30 }
   0x9   :  { %199 = vmatmul.mubr.msk.bf16.vlgmr.msra.gmra.mrb[0].mxu0 %vm48_vm1, %v24_v5  ;;  %p227_p3 = por %p226_p2, %p225_p1 }
   0xb   :  { %p228_p4 = pnand %p227_p3, %p221_p0 }
  0xdc   :  { %v86_v8 = vpop.f32.mrb[0].mxu0 }
  0xdd   :  { %v87_v9 = vadd.f32 %v182_v7, %v86_v8  ;;  %v200_v10 = vpop.f32.mrb[1].mxu0 }
  0xde   :  { %v89_v11 = vpop.f32.mrb[2].mxu0 }
  0xdf   :  { %v95_v12 = vmul.f32 0.70710677, %v87_v9  ;;  %v90_v13 = vadd.f32 %v182_v7, %v89_v11  ;;  %v201_v14 = vpop.f32.mrb[3].mxu0  ;;  %v93_v19 = vmul.f32 0.5, %v87_v9 }
  0xe1   :  { %216 = verf.f32 %v95_v12  ;;  %v96_v15 = vmul.f32 0.70710677, %v90_v13  ;;  %v94_v20 = vmul.f32 0.5, %v90_v13 }
  0xe3   :  { %218 = verf.f32 %v96_v15 }
  0xeb   :  { %v217_v16 = vpop.eup %216 }
  0xec   :  { %v99_v17 = vadd.f32 1.0, %v217_v16 }
  0xed   :  { %v219_v18 = vpop.eup %218 }
  0xee   :  { %v100_v21 = vadd.f32 1.0, %v219_v18  ;;  %v101_v22 = vmul.f32 %v99_v17, %v93_v19 }
  0xf0   :  { %v102_v23 = vmul.f32 %v100_v21, %v94_v20 }
  0xf2   :  { %v103_v24 = vpack.c.bf16 %v102_v23, %v101_v22 }
  0xf4   :  { %205 = vmatmul.mubr.msk.bf16.vlgmr.msra.gmra.mrb[0].mxu1 %vm119_vm2, %v103_v24 }
 0x1c7   :  { %v157_v26 = vpop.f32.mrb[0].mxu1 }
 0x1c8   :  { %v158_v27 = vadd.f32 %v186_v25, %v157_v26  ;;  %v206_v28 = vpop.f32.mrb[1].mxu1 }
 0x1c9   :  { %v160_v29 = vpop.f32.mrb[2].mxu1 }
 0x1ca   :  { %164 = vst [vmem:[#allocation2] sm:$0xff] %v158_v27  ;;  %v161_v30 = vadd.f32 %v186_v25, %v160_v29  ;;  %v207_v31 = vpop.f32.mrb[3].mxu1 }
 0x1cc   :  { %165 = vst [vmem:[#allocation2 + $0x8] sm:$0xff] %v161_v30 }
 0x1cd   :  { %231 = shalt.err (!%p228_p4)
}
 0x1ce   :  { %s232_s7 = scalar_lea.hbm %s317_s5, 256 }
 0x1cf   :  { %p233_p5 = scmp.ne.s32.totalorder %s317_s5, %s232_s7  ;;  %p236_p6 = scmp.lt.u32.totalorder %s232_s7, %s317_s5 }
 0x1d1   :  { %p238_p7 = pnand %p236_p6, %p233_p5 }
 0x1d3   :  { %241 = shalt.err (!%p238_p7)
}
 0x1d4   :  { %s247_s12 = smov 128   ;;  %s248_s13 = smov 8  }
 0x1d5   :  { %177 = dma.vmem_to_hbm [thread:$0]  %s172_s29, 256, %s317_s5, [#allocation3], %s247_s12, %s247_s12, %s248_s13  }
 0x1d6   :  { %242 = dma.done.wait [#allocation3], 256  }
 0x1d7   :  { %243 = vsyncadd [#allocation3], 4294967040 }
 0x1d8   :  { %181 = vsyncpa [#allocation3], 1 }

</bundles_post_ra>
